<compile_context>
chip_gen: v6e
topology: v6e:2x2x1
jax: 0.10.0
libtpu: 0.0.40
codegen_flags: <defaults>
</compile_context>

<pallas_src>
import math

import jax
import jax.numpy as jnp
import numpy as np
from jax.experimental import pallas as pl
from jax.experimental.pallas import tpu as pltpu

_LANES = 128

# Abramowitz & Stegun 7.1.26 coefficients, pre-multiplied by 0.5 so the kernel
# computes 0.5*erf(z) directly (folds the final "out = 0.5*(...)" multiply).
_B1 = np.float32(0.5 * 0.254829592)
_B2 = np.float32(0.5 * -0.284496736)
_B3 = np.float32(0.5 * 1.421413741)
_B4 = np.float32(0.5 * -1.453152027)
_B5 = np.float32(0.5 * 1.061405429)
_P = np.float32(0.3275911)
_ONE = np.float32(1.0)
_HALF = np.float32(0.5)


def _half_erf(z):
    """0.5 * erf(z) via A&S 7.1.26 (max abs err ~0.75e-7 after the 0.5 fold).

    Built only from ops with a Mosaic lowering (mul/add/div/select/exp);
    lax.erf_p has no Pallas-TPU lowering rule.  The reciprocal is EXACT
    (approx=True was the source of the v2 correctness failure).
    """
    az = jnp.abs(z)
    t = _ONE / (_ONE + _P * az)                       # exact f32 divide
    q = ((((_B5 * t + _B4) * t + _B3) * t + _B2) * t + _B1) * t
    r = _HALF - q * jnp.exp(-(az * az))               # = 0.5*|erf(z)|, r >= 0
    return jnp.where(z < np.float32(0.0), -r, r)


def _erf_diff_kernel(params_ref, x_ref, o_ref):
    # params live in SMEM: [inv, c_lo, c_hi]  (no recompile when they change)
    inv = params_ref[0]
    c_lo = params_ref[1]
    c_hi = params_ref[2]
    x = x_ref[...].astype(jnp.float32)                # explicit f32 compute
    s = x * inv
    out = _half_erf(c_hi - s) - _half_erf(c_lo - s)
    o_ref[...] = out.astype(o_ref.dtype)


def _pick_block_rows(rows, block_rows, itemsize):
    """Block sublane count: packed-tile aligned, and >=2 grid steps when the
    input is big enough so both v7x TensorCores get work."""
    sub = 16 if itemsize == 2 else 8                  # (16,128) tile for bf16
    if rows < 2 * sub:
        return rows                                   # single full-extent block
    br = min(block_rows, rows)
    half = ((rows // 2) // sub) * sub                 # guarantees grid >= 2
    br = min(br, half)
    return max(sub, (br // sub) * sub)


def erf_diff_pallas(x, loc, scale, lower, upper, *, block_rows=4096):
    """Elementwise ErfDiff forward via a Pallas TPU kernel."""
    orig_shape = x.shape
    dtype = x.dtype
    n = int(np.prod(orig_shape)) if orig_shape else 1
    if x.size == 0:
        return x

    # Fold the module scalars into three runtime constants.  They are fed to
    # the kernel through SMEM, so varying loc/scale/lower/upper does NOT
    # retrace/recompile the pallas_call (works for traced scalars too).
    scale_f = jnp.asarray(scale, jnp.float32)
    loc_f = jnp.asarray(loc, jnp.float32)
    inv = jnp.float32(1.0 / math.sqrt(2.0)) / scale_f
    c_hi = (jnp.asarray(upper, jnp.float32) - loc_f) * inv
    c_lo = (jnp.asarray(lower, jnp.float32) - loc_f) * inv
    params = jnp.stack([inv, c_lo, c_hi])             # (3,) f32 -> SMEM

    flat = x.reshape(-1)
    pad = (-n) % _LANES
    if pad:
        # <128 extra elements; keeps a single numeric path for every element.
        flat = jnp.pad(flat, (0, pad))
    rows = flat.shape[0] // _LANES
    x2d = flat.reshape(rows, _LANES)

    itemsize = jnp.dtype(dtype).itemsize
    br = _pick_block_rows(rows, block_rows, itemsize)
    grid = (pl.cdiv(rows, br),)

    out2d = pl.pallas_call(
        _erf_diff_kernel,
        out_shape=jax.ShapeDtypeStruct((rows, _LANES), dtype),
        grid=grid,
        in_specs=[
            pl.BlockSpec(memory_space=pltpu.MemorySpace.SMEM),  # params
            pl.BlockSpec((br, _LANES), lambda i: (i, 0)),       # x tile
        ],
        out_specs=pl.BlockSpec((br, _LANES), lambda i: (i, 0)),
        compiler_params=pltpu.CompilerParams(
            dimension_semantics=("parallel",),
        ),
        cost_estimate=pl.CostEstimate(
            flops=45 * n,                 # two half-erf evals + shared work
            transcendentals=4 * n,        # 2 exp + 2 divide per element
            bytes_accessed=2 * n * itemsize,
        ),
    )(params, x2d)

    out_flat = out2d.reshape(-1)
    if pad:
        out_flat = out_flat[:n]
    return out_flat.reshape(orig_shape)


class ErfDiffPallas:
    """Mirror of the PyTorch ErfDiff module (forward only, no mask)."""

    def __init__(self, loc, scale, lower, upper):
        self.loc, self.scale = loc, scale
        self.lower, self.upper = lower, upper

    def __call__(self, x):
        return erf_diff_pallas(x, self.loc, self.scale, self.lower, self.upper)


def _reference(x, loc, scale, lower, upper):
    inv = 1.0 / (math.sqrt(2.0) * scale)
    return 0.5 * (
        jax.scipy.special.erf((upper - loc - x) * inv)
        - jax.scipy.special.erf((lower - loc - x) * inv)
    )


if __name__ == "__main__":
    # Deterministic scalar "parameters" for the module (per __init__ signature).
    loc, scale, lower, upper = 0.1, 1.5, -1.0, 1.0
    mod = ErfDiffPallas(loc, scale, lower, upper)

    key = jax.random.PRNGKey(0)

    # Primary test: NCHW input as in the original module usage (2048 elems,
    # multiple of 128 -> pure bulk path, grid of 2 blocks).
    x = jax.random.normal(key, (2, 4, 16, 16), dtype=jnp.float32)
    out = jax.block_until_ready(mod(x))
    ref = _reference(x, loc, scale, lower, upper)
    assert out.shape == x.shape and out.dtype == x.dtype
    err = float(jnp.max(jnp.abs(out - ref)))
    assert jnp.allclose(out, ref, atol=1e-5), err

    # Secondary test: element count not a multiple of 128 -> padded path.
    x2 = jax.random.normal(jax.random.PRNGKey(0), (3, 4, 10, 10),
                           dtype=jnp.float32)  # 1200 elems
    out2 = jax.block_until_ready(mod(x2))
    ref2 = _reference(x2, loc, scale, lower, upper)
    assert out2.shape == x2.shape and out2.dtype == x2.dtype
    err2 = float(jnp.max(jnp.abs(out2 - ref2)))
    assert jnp.allclose(out2, ref2, atol=1e-5), err2

    print("KERNEL_OK")
</pallas_src>

<mosaic_0001>
module attributes {stable_mosaic.version = 11 : i64} {
  func.func @_erf_diff_kernel(%arg0: i32, %arg1: memref<3xf32, #tpu.memory_space<smem>>, %arg2: memref<8x128xf32, #tpu.memory_space<vmem>>, %arg3: memref<8x128xf32, #tpu.memory_space<vmem>>) attributes {dimension_semantics = [#tpu.dimension_semantics<parallel>], iteration_bounds = array<i64: 2>, scalar_prefetch = 0 : i64, scratch_operands = 0 : i64, tpu.core_type = #tpu.core_type<tc>, window_params = [{transform_indices = @transform_0, window_bounds = array<i64: 3>}, {transform_indices = @transform_1, window_bounds = array<i64: 8, 128>}, {transform_indices = @transform_2, window_bounds = array<i64: 8, 128>}]} {
    %c0 = arith.constant 0 : index
    %0 = memref.load %arg1[%c0] : memref<3xf32, #tpu.memory_space<smem>>
    %c1 = arith.constant 1 : index
    %1 = memref.load %arg1[%c1] : memref<3xf32, #tpu.memory_space<smem>>
    %c2 = arith.constant 2 : index
    %2 = memref.load %arg1[%c2] : memref<3xf32, #tpu.memory_space<smem>>
    %c0_0 = arith.constant 0 : index
    %c0_1 = arith.constant 0 : index
    %3 = vector.load %arg2[%c0_0, %c0_1] : memref<8x128xf32, #tpu.memory_space<vmem>>, vector<8x128xf32>
    %4 = vector.broadcast %0 : f32 to vector<8x128xf32>
    %5 = arith.mulf %3, %4 : vector<8x128xf32>
    %6 = vector.broadcast %2 : f32 to vector<8x128xf32>
    %7 = arith.subf %6, %5 : vector<8x128xf32>
    %8 = math.absf %7 : vector<8x128xf32>
    %cst = arith.constant 0.327591091 : f32
    %9 = vector.broadcast %cst : f32 to vector<8x128xf32>
    %10 = arith.mulf %9, %8 : vector<8x128xf32>
    %cst_2 = arith.constant 1.000000e+00 : f32
    %11 = vector.broadcast %cst_2 : f32 to vector<8x128xf32>
    %12 = arith.addf %11, %10 : vector<8x128xf32>
    %cst_3 = arith.constant 1.000000e+00 : f32
    %13 = vector.broadcast %cst_3 : f32 to vector<8x128xf32>
    %14 = arith.divf %13, %12 : vector<8x128xf32>
    %cst_4 = arith.constant 0.53070271 : f32
    %15 = vector.broadcast %cst_4 : f32 to vector<8x128xf32>
    %16 = arith.mulf %15, %14 : vector<8x128xf32>
    %cst_5 = arith.constant -0.72657603 : f32
    %17 = vector.broadcast %cst_5 : f32 to vector<8x128xf32>
    %18 = arith.addf %16, %17 : vector<8x128xf32>
    %19 = arith.mulf %18, %14 : vector<8x128xf32>
    %cst_6 = arith.constant 0.710706889 : f32
    %20 = vector.broadcast %cst_6 : f32 to vector<8x128xf32>
    %21 = arith.addf %19, %20 : vector<8x128xf32>
    %22 = arith.mulf %21, %14 : vector<8x128xf32>
    %cst_7 = arith.constant -0.142248362 : f32
    %23 = vector.broadcast %cst_7 : f32 to vector<8x128xf32>
    %24 = arith.addf %22, %23 : vector<8x128xf32>
    %25 = arith.mulf %24, %14 : vector<8x128xf32>
    %cst_8 = arith.constant 0.127414793 : f32
    %26 = vector.broadcast %cst_8 : f32 to vector<8x128xf32>
    %27 = arith.addf %25, %26 : vector<8x128xf32>
    %28 = arith.mulf %27, %14 : vector<8x128xf32>
    %29 = arith.mulf %8, %8 : vector<8x128xf32>
    %cst_9 = arith.constant 0.000000e+00 : f32
    %30 = vector.broadcast %cst_9 : f32 to vector<8x128xf32>
    %31 = arith.subf %30, %29 : vector<8x128xf32>
    %32 = math.exp %31 : vector<8x128xf32>
    %33 = arith.mulf %28, %32 : vector<8x128xf32>
    %cst_10 = arith.constant 5.000000e-01 : f32
    %34 = vector.broadcast %cst_10 : f32 to vector<8x128xf32>
    %35 = arith.subf %34, %33 : vector<8x128xf32>
    %cst_11 = arith.constant 0.000000e+00 : f32
    %36 = vector.broadcast %cst_11 : f32 to vector<8x128xf32>
    %37 = arith.cmpf olt, %7, %36 : vector<8x128xf32>
    %cst_12 = arith.constant 0.000000e+00 : f32
    %38 = vector.broadcast %cst_12 : f32 to vector<8x128xf32>
    %39 = arith.subf %38, %35 : vector<8x128xf32>
    %40 = arith.select %37, %39, %35 : vector<8x128xi1>, vector<8x128xf32>
    %41 = vector.broadcast %1 : f32 to vector<8x128xf32>
    %42 = arith.subf %41, %5 : vector<8x128xf32>
    %43 = math.absf %42 : vector<8x128xf32>
    %cst_13 = arith.constant 0.327591091 : f32
    %44 = vector.broadcast %cst_13 : f32 to vector<8x128xf32>
    %45 = arith.mulf %44, %43 : vector<8x128xf32>
    %cst_14 = arith.constant 1.000000e+00 : f32
    %46 = vector.broadcast %cst_14 : f32 to vector<8x128xf32>
    %47 = arith.addf %46, %45 : vector<8x128xf32>
    %cst_15 = arith.constant 1.000000e+00 : f32
    %48 = vector.broadcast %cst_15 : f32 to vector<8x128xf32>
    %49 = arith.divf %48, %47 : vector<8x128xf32>
    %cst_16 = arith.constant 0.53070271 : f32
    %50 = vector.broadcast %cst_16 : f32 to vector<8x128xf32>
    %51 = arith.mulf %50, %49 : vector<8x128xf32>
    %cst_17 = arith.constant -0.72657603 : f32
    %52 = vector.broadcast %cst_17 : f32 to vector<8x128xf32>
    %53 = arith.addf %51, %52 : vector<8x128xf32>
    %54 = arith.mulf %53, %49 : vector<8x128xf32>
    %cst_18 = arith.constant 0.710706889 : f32
    %55 = vector.broadcast %cst_18 : f32 to vector<8x128xf32>
    %56 = arith.addf %54, %55 : vector<8x128xf32>
    %57 = arith.mulf %56, %49 : vector<8x128xf32>
    %cst_19 = arith.constant -0.142248362 : f32
    %58 = vector.broadcast %cst_19 : f32 to vector<8x128xf32>
    %59 = arith.addf %57, %58 : vector<8x128xf32>
    %60 = arith.mulf %59, %49 : vector<8x128xf32>
    %cst_20 = arith.constant 0.127414793 : f32
    %61 = vector.broadcast %cst_20 : f32 to vector<8x128xf32>
    %62 = arith.addf %60, %61 : vector<8x128xf32>
    %63 = arith.mulf %62, %49 : vector<8x128xf32>
    %64 = arith.mulf %43, %43 : vector<8x128xf32>
    %cst_21 = arith.constant 0.000000e+00 : f32
    %65 = vector.broadcast %cst_21 : f32 to vector<8x128xf32>
    %66 = arith.subf %65, %64 : vector<8x128xf32>
    %67 = math.exp %66 : vector<8x128xf32>
    %68 = arith.mulf %63, %67 : vector<8x128xf32>
    %cst_22 = arith.constant 5.000000e-01 : f32
    %69 = vector.broadcast %cst_22 : f32 to vector<8x128xf32>
    %70 = arith.subf %69, %68 : vector<8x128xf32>
    %cst_23 = arith.constant 0.000000e+00 : f32
    %71 = vector.broadcast %cst_23 : f32 to vector<8x128xf32>
    %72 = arith.cmpf olt, %42, %71 : vector<8x128xf32>
    %cst_24 = arith.constant 0.000000e+00 : f32
    %73 = vector.broadcast %cst_24 : f32 to vector<8x128xf32>
    %74 = arith.subf %73, %70 : vector<8x128xf32>
    %75 = arith.select %72, %74, %70 : vector<8x128xi1>, vector<8x128xf32>
    %76 = arith.subf %40, %75 : vector<8x128xf32>
    %c0_25 = arith.constant 0 : index
    %c0_26 = arith.constant 0 : index
    %77 = vector.load %arg3[%c0_25, %c0_26] : memref<8x128xf32, #tpu.memory_space<vmem>>, vector<8x128xf32>
    tpu.vector_store %arg3[%c0_25, %c0_26], %76 {strides = array<i32>} : memref<8x128xf32, #tpu.memory_space<vmem>>, vector<8x128xf32>,
    return
  }
  func.func @transform_0(%arg0: i32) -> i32 {
    %c0_i32 = arith.constant 0 : i32
    %c0_i32_0 = arith.constant 0 : i32
    return %c0_i32 : i32
  }
  func.func @transform_1(%arg0: i32) -> (i32, i32) {
    %c0_i32 = arith.constant 0 : i32
    %c0_i32_0 = arith.constant 0 : i32
    return %arg0, %c0_i32 : i32, i32
  }
  func.func @transform_2(%arg0: i32) -> (i32, i32) {
    %c0_i32 = arith.constant 0 : i32
    %c0_i32_0 = arith.constant 0 : i32
    return %arg0, %c0_i32 : i32, i32
  }
}

</mosaic_0001>

<bundles_post_ra>
// kernel: tpu_custom_call.1
= control target key start
LH: loop header
LB: loop body
LE: loop exit
PB: predicated region body
PF: predicated region fallthrough
CT: control target
= control target key end

     0   :  { %7 = vsyncpa [#allocation5], 0  ;;  %s689_s0 = inlined_call_operand.hbm [shape: f32[3], index: 0, kind: input, shape index: {}]   ;;  %s690_s1 = inlined_call_operand.hbm [shape: f32[16,128], index: 1, kind: input, shape index: {}]   ;;  %s691_s2 = inlined_call_operand.hbm [shape: f32[16,128], index: 2, kind: output, shape index: {}]  }
   0x1   :  { %8 = vsyncpa [#allocation3], 0 }
   0x2   :  { %10 = vsyncpa [#allocation3 + $0x1], 0 }
   0x3   :  { %11 = vsyncpa [#allocation4], 0 }
   0x4   :  { %13 = vsyncpa [#allocation4 + $0x1], 0  ;;  %s533_s9 = smov 0   ;;  %s535_s10 = smov 0  }
   0x5   :  { %s537_s11 = smov 0   ;;  %s539_s12 = smov 0  }
   0x6 LB: > { %s554_s13 = sadd.s32 4294967295, %s513_s12   ;;  %s325_s14 = sadd.s32 4294967294, %s513_s12   ;;  %s513_s12 = sphi %s539_s12, %s711_s12   ;;  %s509_s11 = sphi %s537_s11, %s710_s11   ;;  %s505_s10 = sphi %s535_s10, %s709_s10   ;;  %s501_s9 = sphi %s533_s9, %s708_s9  }
   0x7   : > { %p60_p0 = scmp.ne.s32.totalorder %s505_s10, %s501_s9  ;;  %p692_p1 = scmp.eq.s32.totalorder %s554_s13, 0 }
   0x8   : > { %p84_p2 = scmp.eq.s32.totalorder %s554_s13, 1  ;;  %p90_p3 = scmp.eq.s32.totalorder %s325_s14, 1 }
   0x9   : > { %p563_p4 = por %p692_p1, %p60_p0  ;;  %p326_p5 = scmp.ge.s32.totalorder %s513_s12, 1 }
   0xa   : > { %p568_p6 = por %p90_p3, %p60_p0  ;;  %p97_p7 = scmp.lt.s32.totalorder %s513_s12, 3 }
   0xb   : > { %s696_s15 = scalar_select %p563_p4, 1, 0 }
   0xc   : > { %s697_s16 = scalar_select %p568_p6, 1, 0 }
   0xd   : > { %p573_p8 = pnand %p326_p5, %p97_p7  ;;  %s579_s18 = sadd.s32 1, %s513_s12  }
   0xe   : > { %s44_s19 = ssub.s32 %s513_s12, %s579_s18  ;;  %s47_s20 = sadd.s32 1, %s509_s11 }
   0xf   : > { %s698_s17 = scalar_select %p573_p8, 1, 0 }
  0x10   : > { %p349_p10 = pneg %p573_p8  ;;  %p45_p12 = scmp.eq.s32.totalorder %s44_s19, 0 }
  0x11   : > { %p54_p13 = scmp.ne.s32.totalorder %s509_s11, %s505_s10  ;;  %p55_p0 = scmp.eq.s32.totalorder %s513_s12, 0 }
  0x12   : > { %p350_p11 = pnand %p349_p10, %p692_p1  ;;  %p362_p3 = scmp.lt.s32.totalorder %s513_s12, 2 }
  0x13   : > { %s515_s21 = smov [#allocation2]   ;;  %p56_p5 = por %p55_p0, %p54_p13 }
  0x14   : > { %352 = dma.hbm_to_smem (!%p350_p11), %s689_s0, 16, %s515_s21, [#allocation5]  }
  0x15   : > { %s596_s24 = scalar_select %p45_p12, %s509_s11, %s47_s20  }
  0x16   : > { %p600_p7 = por %p84_p2, %p54_p13  ;;  %s119_s26 = sand.u32 1, %s509_s11  }
  0x17   : > { %s330_s27 = sshll.u32 %s513_s12, 7  ;;  %s329_s28 = sshll.u32 %s119_s26, 3 }
  0x18   : > { %s699_s25 = scalar_select %p600_p7, 1, 0 }
  0x19   : > { %s609_s3 = scalar_lea.hbm %s690_s1, %s330_s27  ;;  %s123_s4 = scalar_lea.vmem [#allocation6], %s329_s28 }
  0x1a   : > { %s130_s5 = sshll.u32 %s123_s4, 4  ;;  %p611_p10 = pnand %p362_p3, %p56_p5  ;;  %s131_s5 = int_to_ptr.vmem [resolvable:$true] %s130_s5 }
  0x1b   : > { %s120_s7 = scalar_lea.sflag [#allocation3], %s119_s26  ;;  %s417_s8 = scalar_lea.hbm %s609_s3, 128 }
  0x1c   : > { %p418_p2 = scmp.ne.s32.totalorder %s609_s3, %s417_s8  ;;  %p419_p11 = pneg %p611_p10 }
  0x1d   : > { %s422_s20 = scalar_lea.hbm %s690_s1, 256  ;;  %p423_p0 = scmp.lt.s32.totalorder %s609_s3, %s690_s1 }
  0x1e   : > { %p420_p12 = pnand %p419_p11, %p418_p2  ;;  %p424_p3 = scmp.lt.s32.totalorder %s422_s20, %s417_s8 }
  0x20   : > { %p421_p13 = pneg %p420_p12  ;;  %p425_p5 = por %p424_p3, %p423_p0 }
  0x22   : > { %p426_p9 = pnand %p425_p5, %p421_p13 }
  0x24   : > { %429 = shalt.err (!%p426_p9)
}
  0x25   : > { %s430_s23 = scalar_lea.vmem %s131_s5, 128  ;;  %s516_s26 = smov [#allocation6]  }
  0x26   : > { %p431_p1 = scmp.ne.s32.totalorder %s131_s5, %s430_s23  ;;  %s435_s27 = sshll.u32 %s516_s26, 4  ;;  %s436_s27 = int_to_ptr.vmem [resolvable:$false] %s435_s27 }
  0x27   : > { %s437_s28 = scalar_lea.vmem %s436_s27, 256  ;;  %p438_p2 = scmp.lt.s32.totalorder %s131_s5, %s436_s27 }
  0x28   : > { %p433_p6 = pnand %p431_p1, %p419_p11  ;;  %p439_p12 = scmp.lt.s32.totalorder %s437_s28, %s430_s23 }
  0x2a   : > { %p434_p7 = pneg %p433_p6  ;;  %p440_p4 = por %p439_p12, %p438_p2 }
  0x2c   : > { %p441_p8 = pnand %p440_p4, %p434_p7 }
  0x2e   : > { %444 = shalt.err (!%p441_p8)
}
  0x2f   : > { %356 = dma.hbm_to_vmem [thread:$0]  (!%p611_p10), %s609_s3, 128, %s131_s5, %s120_s7  }
  0x30   : > { %p701_p13 = scmp.ne.s32.totalorder %s698_s17, 0 }
  0x31   : > { %p702_p9 = scmp.eq.s32.totalorder (!%p701_p13), %s554_s13, 0 }
  0x32   : > { %139 = sbr.rel (%p701_p13) target bundleno = 134 (0x86), region = 28 }
  0x37   : > { %488 = dma.done.wait (%p702_p9), [#allocation5], 16   ;;  %p703_p1 = pmov %p702_p9 }
  0x38   : > { %s636_s29 = sand.u32 1, %s505_s10   ;;  %p704_p4 = scmp.ne.s32.totalorder %s696_s15, 0 }
  0x39   : > { %490 = vsyncadd (%p703_p1), [#allocation5], 4294967280  ;;  %s333_s30 = sshll.u32 %s636_s29, 3  ;;  %s146_s4 = scalar_lea.sflag [#allocation3], %s636_s29 }
  0x3a   : > { %s149_s3 = scalar_lea.vmem [#allocation6], %s333_s30 }
  0x3b   : > { %492 = dma.done.wait (%p704_p4), %s146_s4, 128  }
  0x3c   : > { %494 = vsyncadd (%p704_p4), %s146_s4, 4294967168 }
  0x3d   : > { %154 = sfence }
  0x3e   : > { %s171_s17 = sld [smem:[#allocation2]]  ;;  %v174_v0 = vld [vmem:[%s149_s3] sm:$0xff]  ;;  %s170_s15 = scalar_lea.vmem [#allocation7], %s333_s30 }
  0x3f   : > { %s335_s5 = sld [smem:[#allocation2 + $0x1]]  ;;  %s243_s7 = sshll.u32 %s170_s15, 4  ;;  %s649_s7 = int_to_ptr.vmem [resolvable:$true] %s243_s7 }
  0x40   : > { %s336_s6 = sld [smem:[#allocation2 + $0x2]]  ;;  %s338_s8 = sshll.u32 %s554_s13, 7 }
  0x41   : > { %s241_s20 = scalar_lea.hbm %s691_s2, %s338_s8  ;;  %s230_s21 = scalar_lea.sflag [#allocation4], %s636_s29 }
  0x42   : > { %s445_s22 = scalar_lea.vmem %s649_s7, 128  ;;  %p705_p8 = scmp.ne.s32.totalorder %s699_s25, 0 }
  0x43   : > { %p446_p6 = scmp.ne.s32.totalorder %s649_s7, %s445_s22  ;;  %s517_s13 = smov [#allocation7]  }
  0x44   : > { %v175_v1 = vstv %s171_s17  ;;  %s449_s23 = sshll.u32 %s517_s13, 4  ;;  %s450_s23 = int_to_ptr.vmem [resolvable:$false] %s449_s23 }
  0x45   : > { %v176_v2 = vmul.f32 %v175_v1, %v174_v0  ;;  %v202_v3 = vstv %s335_s5  ;;  %p447_p7 = pnand %p446_p6, %p705_p8  ;;  %s451_s26 = scalar_lea.vmem %s450_s23, 256 }
  0x46   : > { %v177_v4 = vstv %s336_s6  ;;  %p452_p11 = scmp.lt.s32.totalorder %s649_s7, %s450_s23  ;;  %p453_p0 = scmp.lt.s32.totalorder %s451_s26, %s445_s22 }
  0x47   : > { %v178_v5 = vsub.f32 %v177_v4, %v176_v2  ;;  %v203_v6 = vsub.f32 %v202_v3, %v176_v2  ;;  %p448_p10 = pneg %p447_p7 }
  0x48   : > { %p454_p3 = por %p453_p0, %p452_p11 }
  0x49   : > { %v179_v7 = vand.u32 2147483647, %v178_v5  ;;  %v204_v8 = vand.u32 2147483647, %v203_v6  ;;  %vm199_vm0 = vcmp.lt.f32.partialorder %v178_v5, 0.0  ;;  %vm224_vm1 = vcmp.lt.f32.partialorder %v203_v6, 0.0 }
  0x4a   : > { %p455_p5 = pnand %p454_p3, %p448_p10 }
  0x4b   : > { %v180_v9 = vmul.f32 0.3275911, %v179_v7  ;;  %v205_v10 = vmul.f32 0.3275911, %v204_v8  ;;  %v193_v13 = vmul.f32 %v179_v7, %v179_v7  ;;  %v218_v14 = vmul.f32 %v204_v8, %v204_v8 }
  0x4d   : > { %v181_v11 = vadd.f32 1.0, %v180_v9  ;;  %v206_v12 = vadd.f32 1.0, %v205_v10  ;;  %v194_v15 = vsub.f32 0.0, %v193_v13  ;;  %v219_v16 = vsub.f32 0.0, %v218_v14 }
  0x4f   : > { %398 = vrcp.f32 %v181_v11  ;;  %v195_v17 = vmul.f32 1.442695, %v194_v15  ;;  %v220_v19 = vmul.f32 1.442695, %v219_v16 }
  0x50   : > { %400 = vrcp.f32 %v206_v12 }
  0x51   : > { %402 = vpow2.f32 %v195_v17 }
  0x52   : > { %404 = vpow2.f32 %v220_v19 }
  0x5c   : > { %v399_v18 = vpop.eup %398 }
  0x5d   : > { %v401_v20 = vpop.eup %400  ;;  %v184_v21 = vmul.f32 0.5307027, %v399_v18 }
  0x5e   : > { %v209_v22 = vmul.f32 0.5307027, %v401_v20  ;;  %v403_v36 = vpop.eup %402 }
  0x5f   : > { %v185_v23 = vadd.f32 -0.72657603, %v184_v21  ;;  %v405_v38 = vpop.eup %404 }
  0x60   : > { %v210_v24 = vadd.f32 -0.72657603, %v209_v22 }
  0x61   : > { %v186_v25 = vmul.f32 %v399_v18, %v185_v23 }
  0x62   : > { %v211_v26 = vmul.f32 %v401_v20, %v210_v24 }
  0x63   : > { %v187_v27 = vadd.f32 0.7107069, %v186_v25 }
  0x64   : > { %v212_v28 = vadd.f32 0.7107069, %v211_v26 }
  0x65   : > { %v188_v29 = vmul.f32 %v399_v18, %v187_v27 }
  0x66   : > { %v213_v30 = vmul.f32 %v401_v20, %v212_v28 }
  0x67   : > { %v189_v31 = vadd.f32 -0.14224836, %v188_v29 }
  0x68   : > { %v214_v32 = vadd.f32 -0.14224836, %v213_v30 }
  0x69   : > { %v190_v33 = vmul.f32 %v399_v18, %v189_v31 }
  0x6a   : > { %v215_v34 = vmul.f32 %v401_v20, %v214_v32 }
  0x6b   : > { %v191_v35 = vadd.f32 0.1274148, %v190_v33 }
  0x6c   : > { %v216_v37 = vadd.f32 0.1274148, %v215_v34 }
  0x6d   : > { %v192_v39 = vmul.f32 %v399_v18, %v191_v35 }
  0x6e   : > { %v217_v40 = vmul.f32 %v401_v20, %v216_v37 }
  0x6f   : > { %v197_v41 = vmul.f32 %v403_v36, %v192_v39 }
  0x70   : > { %v222_v42 = vmul.f32 %v405_v38, %v217_v40 }
  0x71   : > { %v198_v43 = vsub.f32 0.5, %v197_v41 }
  0x72   : > { %v223_v44 = vsub.f32 0.5, %v222_v42 }
  0x73   : > { %v200_v45 = vsub.f32 0.0, %v198_v43 }
  0x74   : > { %v225_v46 = vsub.f32 0.0, %v223_v44 }
  0x75   : > { %v201_v47 = vsel %vm199_vm0, %v200_v45, %v198_v43 }
  0x76   : > { %v226_v48 = vsel %vm224_vm1, %v225_v46, %v223_v44 }
  0x77   : > { %v227_v49 = vsub.f32 %v201_v47, %v226_v48 }
  0x79   : > { %228 = vst [vmem:[%s170_s15] sm:$0xff] %v227_v49 }
  0x7a   : > { %458 = shalt.err (!%p455_p5)
}
  0x7b   : > { %s459_s27 = scalar_lea.hbm %s241_s20, 128  ;;  %s463_s30 = scalar_lea.hbm %s691_s2, 256 }
  0x7c   : > { %p460_p2 = scmp.ne.s32.totalorder %s241_s20, %s459_s27  ;;  %p464_p9 = scmp.lt.s32.totalorder %s241_s20, %s691_s2 }
  0x7d   : > { %p465_p1 = scmp.lt.s32.totalorder %s463_s30, %s459_s27 }
  0x7e   : > { %p461_p12 = pnand %p460_p2, %p705_p8 }
  0x7f   : > { %p466_p4 = por %p465_p1, %p464_p9 }
  0x80   : > { %p462_p13 = pneg %p461_p12 }
  0x82   : > { %p467_p6 = pnand %p466_p4, %p462_p13 }
  0x84   : > { %470 = shalt.err (!%p467_p6)
}
  0x85   : > { %347 = dma.vmem_to_hbm [thread:$0]  (%p705_p8), %s649_s7, 128, %s241_s20, %s230_s21  }
  0x86 PF: > { %s255_s17 = sand.u32 1, %s501_s9   ;;  %p706_p7 = scmp.ne.s32.totalorder %s697_s16, 0 }
  0x87   : > { %p707_p10 = scmp.ge.s32.totalorder %s513_s12, 2  ;;  %s256_s5 = scalar_lea.sflag [#allocation4], %s255_s17 }
  0x89   : > { %p358_p11 = pnand %p707_p10, %p706_p7 }
  0x8b   : > { %p359_p0 = pneg %p358_p11 }
  0x8d   : > { %496 = dma.done.wait (%p359_p0), %s256_s5, 128  }
  0x8e   : > { %498 = vsyncadd (%p359_p0), %s256_s5, 4294967168  ;;  %p16_p3 = scmp.ge.s32.totalorder %s579_s18, 4   ;;  %s708_s9 = smov %s505_s10 }
  0x8f   : > { %s709_s10 = smov %s509_s11  ;;  %s710_s11 = smov %s596_s24 }
  0x90   : > { %s711_s12 = smov %s579_s18  ;;  %18 = sbr.rel (!%p16_p3) target bundleno = 6 (0x6), region = 78 }
  0x95   :  { %261 = vsyncpa [#allocation3], 1 }
  0x96   :  { %263 = vsyncpa [#allocation3 + $0x1], 1 }
  0x97   :  { %264 = vsyncpa [#allocation4], 1 }
  0x98   :  { %266 = vsyncpa [#allocation4 + $0x1], 1 }
  0x99   :  { %267 = vsyncpa [#allocation5], 1 }
  0x9a   :  { %269 = vsyncpa [#allocation5 + $0x1], 1 }

</bundles_post_ra>
